<compile_context>
chip_gen: v7x
topology: tpu7x:2x2x1
jax: 0.10.0
libtpu: 0.0.40
codegen_flags: <defaults>
</compile_context>

<pallas_src>
import functools

import jax
import jax.numpy as jnp
from jax.experimental import pallas as pl
from jax.experimental.pallas import tpu as pltpu


# ----------------------------------------------------------------------------
# Kernel 1: update/reset gates, candidate x-side pre-activation, and H*R
#           (row tiled over nodes).
# ----------------------------------------------------------------------------
def gates_kernel(lhat_ref, xh_ref, x_ref, h_ref, wx_ref, wh_ref, b_ref,
                 zch_ref, hr16_ref):
    fin = x_ref.shape[1]
    hdim = h_ref.shape[1]

    # T1 for X and H in one bf16 MXU pass:  [LX | LH] = L_hat_blk @ [X | H]
    lxh = jnp.dot(lhat_ref[...], xh_ref[...], preferred_element_type=jnp.float32)
    lx = lxh[:, :fin]
    lh = lxh[:, fin:]

    # Fused ChebConv(K=2) + gate fusion:
    #   x-side: [X | LX] @ [Wxz;Wxr;Wxh]          -> (tm, 3H)
    #   h-side: [H | LH] @ [Whz;Whr;0]            -> (tm, 3H)  (candidate cols 0)
    xt = jnp.concatenate([x_ref[...], lx], axis=1)          # (tm, 2*fin)  f32
    ht = jnp.concatenate([h_ref[...], lh], axis=1)          # (tm, 2*hdim) f32
    pre = (jnp.dot(xt, wx_ref[...], preferred_element_type=jnp.float32)
           + jnp.dot(ht, wh_ref[...], preferred_element_type=jnp.float32)
           + b_ref[...])

    # pre columns: [Z_pre | R_pre | cand_x_pre]
    z = jax.nn.sigmoid(pre[:, 0:hdim])
    r = jax.nn.sigmoid(pre[:, hdim:2 * hdim])
    cand = pre[:, 2 * hdim:3 * hdim]
    hr = h_ref[...] * r

    # Packed lane-dense store: [Z | cand_x_pre | H*R]  (R itself is not needed
    # downstream, only H*R), plus a bf16 copy of H*R for pass 2's L_hat matmul.
    zch_ref[...] = jnp.concatenate([z, cand, hr], axis=1)
    hr16_ref[...] = hr.astype(jnp.bfloat16)


# ----------------------------------------------------------------------------
# Kernel 2: candidate state, new hidden state, encoder head + pooled sigmoid
# ----------------------------------------------------------------------------
def update_kernel(lhat_ref, hr16_ref, zch_ref, h_ref, whh_ref, wl_ref,
                  bl_ref, h0_ref, pooled_ref, acc_ref, *, inv_n):
    i = pl.program_id(0)
    hdim = h_ref.shape[1]

    @pl.when(i == 0)
    def _():
        acc_ref[...] = jnp.zeros_like(acc_ref)

    # Candidate T1:  LHR = L_hat_blk @ (H * R)   (bf16 operands, f32 accumulate)
    lhr = jnp.dot(lhat_ref[...], hr16_ref[...], preferred_element_type=jnp.float32)

    z = zch_ref[:, 0:hdim]
    cand_pre = zch_ref[:, hdim:2 * hdim]
    hr = zch_ref[:, 2 * hdim:3 * hdim]

    # Fused candidate ChebConv(K=2):  [HR | LHR] @ [Whh0 ; Whh1]
    h_tilde = jnp.tanh(
        cand_pre + jnp.dot(jnp.concatenate([hr, lhr], axis=1), whh_ref[...],
                           preferred_element_type=jnp.float32))

    h0 = z * h_ref[...] + (1.0 - z) * h_tilde
    h0_ref[...] = h0

    # Encoder head: Linear(relu(h0)); discriminator: relu + mean-pool (partial
    # sums accumulated across row blocks in a VMEM scratch).
    enc = (jnp.dot(jnp.maximum(h0, 0.0), wl_ref[...],
                   preferred_element_type=jnp.float32) + bl_ref[...])
    acc_ref[...] += jnp.sum(jnp.maximum(enc, 0.0), axis=0, keepdims=True)

    @pl.when(i == pl.num_programs(0) - 1)
    def _():
        pooled_ref[...] = jax.nn.sigmoid(acc_ref[...] * inv_n)


# ----------------------------------------------------------------------------
# Plain-JAX glue
# ----------------------------------------------------------------------------
def scaled_laplacian(edge_index, edge_weight, num_nodes, lambda_max=2.0):
    """L_hat = (2/lambda_max) * (I - D^-1/2 A D^-1/2) - I  ('sym').

    For the default lambda_max = 2.0 the identity terms cancel exactly, so no
    eye() adds are materialized.
    """
    row, col = edge_index[0], edge_index[1]
    a = jnp.zeros((num_nodes, num_nodes), jnp.float32).at[row, col].add(edge_weight)
    deg = a.sum(axis=1)
    dinv = jnp.where(deg > 0, jax.lax.rsqrt(jnp.where(deg > 0, deg, 1.0)), 0.0)
    norm_a = dinv[:, None] * a * dinv[None, :]
    scale = 2.0 / lambda_max
    lhat = -scale * norm_a
    if scale != 1.0:
        lhat = lhat + (scale - 1.0) * jnp.eye(num_nodes, dtype=jnp.float32)
    return lhat


def _pick_block_rows(n, candidates=(512, 256, 128, 64, 32, 16, 8)):
    for c in candidates:
        if n % c == 0:
            return c
    return n


def init_params(key, input_dim, hidden_dim, latent_dim):
    ks = jax.random.split(key, 14)
    s = 0.1

    def w(k, i, o):
        return s * jax.random.normal(k, (2, i, o), jnp.float32)

    p = {
        # raw ChebConv weights (K=2): (2, in, out) — kept for the reference
        "wxz": w(ks[0], input_dim, hidden_dim),
        "whz": w(ks[1], hidden_dim, hidden_dim),
        "wxr": w(ks[2], input_dim, hidden_dim),
        "whr": w(ks[3], hidden_dim, hidden_dim),
        "wxh": w(ks[4], input_dim, hidden_dim),
        "whh": w(ks[5], hidden_dim, hidden_dim),
        # per-gate biases = (x-conv bias + h-conv bias)
        "bz": s * (jax.random.normal(ks[6], (1, hidden_dim), jnp.float32)
                   + jax.random.normal(ks[7], (1, hidden_dim), jnp.float32)),
        "br": s * (jax.random.normal(ks[8], (1, hidden_dim), jnp.float32)
                   + jax.random.normal(ks[9], (1, hidden_dim), jnp.float32)),
        "bh": s * (jax.random.normal(ks[10], (1, hidden_dim), jnp.float32)
                   + jax.random.normal(ks[11], (1, hidden_dim), jnp.float32)),
        # Encoder Linear: torch weight (latent, hidden) stored transposed
        "wl": s * jax.random.normal(ks[12], (hidden_dim, latent_dim), jnp.float32),
        "bl": s * jax.random.normal(ks[13], (1, latent_dim), jnp.float32),
        # NOTE: GraphSeqDiscriminator.linear(latent -> 1) is not created: the
        # torch forward discards its output (out = sigmoid(z_pooled)).
    }

    # --- fused layouts consumed by the kernels ---------------------------------
    def fuse_k(wk):                      # (2, i, o) -> (2i, o)  ([W0; W1])
        return wk.reshape(2 * wk.shape[1], wk.shape[2])

    p["wx_all"] = jnp.concatenate(
        [fuse_k(p["wxz"]), fuse_k(p["wxr"]), fuse_k(p["wxh"])], axis=1)       # (2*in, 3H)
    p["wh_zr"] = jnp.concatenate(
        [fuse_k(p["whz"]), fuse_k(p["whr"]),
         jnp.zeros((2 * hidden_dim, hidden_dim), jnp.float32)], axis=1)       # (2H, 3H)
    p["whh_f"] = fuse_k(p["whh"])                                             # (2H, H)
    p["b_all"] = jnp.concatenate([p["bz"], p["br"], p["bh"]], axis=1)         # (1, 3H)
    return p


def graph_seq_discriminator_forward(x, edge_index, edge_weight, h, params,
                                    *, block_rows=None):
    n, fin = x.shape
    hdim = h.shape[1]
    ldim = params["wl"].shape[1]

    lhat = scaled_laplacian(edge_index, edge_weight, n)
    lhat_bf16 = lhat.astype(jnp.bfloat16)          # bf16 stream, f32 accumulate

    tm = _pick_block_rows(n) if block_rows is None else block_rows
    assert n % tm == 0 and tm % 8 == 0, "block_rows must divide N and be a multiple of 8"
    nb = n // tm

    xh_bf16 = jnp.concatenate([x, h], axis=1).astype(jnp.bfloat16)

    lhat_spec = pl.BlockSpec((tm, n), lambda i: (i, 0))
    full = lambda shape: pl.BlockSpec(shape, lambda i: (0, 0))
    rows = lambda c: pl.BlockSpec((tm, c), lambda i: (i, 0))

    # ---- pass 1: Z, candidate x-side pre-activation, H*R (packed) ------------
    zch, hr16 = pl.pallas_call(
        gates_kernel,
        out_shape=(jax.ShapeDtypeStruct((n, 3 * hdim), jnp.float32),
                   jax.ShapeDtypeStruct((n, hdim), jnp.bfloat16)),
        grid_spec=pltpu.PrefetchScalarGridSpec(
            num_scalar_prefetch=0,
            grid=(nb,),
            in_specs=[lhat_spec,
                      full((n, fin + hdim)),
                      rows(fin),
                      rows(hdim),
                      full((2 * fin, 3 * hdim)),
                      full((2 * hdim, 3 * hdim)),
                      full((1, 3 * hdim))],
            out_specs=(rows(3 * hdim), rows(hdim))),
        compiler_params=pltpu.CompilerParams(
            dimension_semantics=("parallel",)),
    )(lhat_bf16, xh_bf16, x, h, params["wx_all"], params["wh_zr"], params["b_all"])

    # ---- pass 2: candidate, new hidden state, head + pooled sigmoid ----------
    h0, pooled = pl.pallas_call(
        functools.partial(update_kernel, inv_n=1.0 / n),
        out_shape=(jax.ShapeDtypeStruct((n, hdim), jnp.float32),
                   jax.ShapeDtypeStruct((1, ldim), jnp.float32)),
        grid_spec=pltpu.PrefetchScalarGridSpec(
            num_scalar_prefetch=0,
            grid=(nb,),
            in_specs=[lhat_spec,
                      full((n, hdim)),          # H*R (bf16, all nodes)
                      rows(3 * hdim),           # packed [Z | cand_pre | H*R]
                      rows(hdim),               # H (f32)
                      full((2 * hdim, hdim)),
                      full((hdim, ldim)),
                      full((1, ldim))],
            out_specs=(rows(hdim),
                       pl.BlockSpec((1, ldim), lambda i: (0, 0))),
            scratch_shapes=[pltpu.VMEM((1, ldim), jnp.float32)]),
        compiler_params=pltpu.CompilerParams(
            dimension_semantics=("arbitrary",)),   # pooled reduction across row blocks
    )(lhat_bf16, hr16, zch, h, params["whh_f"], params["wl"], params["bl"])

    return pooled[0], h0


# ----------------------------------------------------------------------------
# Pure-JAX (f32) reference of the same forward, for the correctness check.
# ----------------------------------------------------------------------------
def reference_forward(x, edge_index, edge_weight, h, params):
    lhat = scaled_laplacian(edge_index, edge_weight, x.shape[0])

    def cheb(t, w):
        return t @ w[0] + (lhat @ t) @ w[1]

    z = jax.nn.sigmoid(cheb(x, params["wxz"]) + cheb(h, params["whz"]) + params["bz"])
    r = jax.nn.sigmoid(cheb(x, params["wxr"]) + cheb(h, params["whr"]) + params["br"])
    h_tilde = jnp.tanh(cheb(x, params["wxh"]) + cheb(h * r, params["whh"]) + params["bh"])
    h0 = z * h + (1.0 - z) * h_tilde
    enc = jnp.maximum(h0, 0.0) @ params["wl"] + params["bl"]
    z_pooled = jnp.maximum(enc, 0.0).mean(axis=0)
    out = jax.nn.sigmoid(z_pooled)     # torch forward discards self.linear(z_pooled)
    return out, h0


if __name__ == "__main__":
    N, E = 256, 1024                       # nodes, directed edges
    input_dim, hidden_dim, latent_dim = 4, 32, 16

    key = jax.random.PRNGKey(0)
    k_x, k_h, k_ei, k_ew, k_p = jax.random.split(key, 5)

    x = jax.random.normal(k_x, (N, input_dim), jnp.float32)
    h = jax.random.normal(k_h, (N, hidden_dim), jnp.float32)
    edge_index = jax.random.randint(k_ei, (2, E), 0, N, dtype=jnp.int32)
    edge_weight = jax.random.uniform(k_ew, (E,), jnp.float32, 0.5, 1.5)
    params = init_params(k_p, input_dim, hidden_dim, latent_dim)

    out, h0 = graph_seq_discriminator_forward(
        x, edge_index, edge_weight, h, params, block_rows=128)   # 2 row blocks
    jax.block_until_ready((out, h0))

    out_ref, h0_ref = reference_forward(x, edge_index, edge_weight, h, params)
    assert out.shape == (latent_dim,) and h0.shape == (N, hidden_dim)
    # bf16 L_hat path (f32 accumulation) vs pure-f32 reference -> loosened tolerance
    assert jnp.allclose(h0, h0_ref, atol=2e-2, rtol=2e-2), \
        float(jnp.max(jnp.abs(h0 - h0_ref)))
    assert jnp.allclose(out, out_ref, atol=2e-2, rtol=2e-2), \
        float(jnp.max(jnp.abs(out - out_ref)))

    print("KERNEL_OK")
</pallas_src>

<mosaic_0001>
module attributes {stable_mosaic.version = 11 : i64} {
  func.func @gates_kernel(%arg0: i32, %arg1: memref<128x256xbf16, #tpu.memory_space<vmem>>, %arg2: memref<256x36xbf16, #tpu.memory_space<vmem>>, %arg3: memref<128x4xf32, #tpu.memory_space<vmem>>, %arg4: memref<128x32xf32, #tpu.memory_space<vmem>>, %arg5: memref<8x96xf32, #tpu.memory_space<vmem>>, %arg6: memref<64x96xf32, #tpu.memory_space<vmem>>, %arg7: memref<1x96xf32, #tpu.memory_space<vmem>>, %arg8: memref<128x96xf32, #tpu.memory_space<vmem>>, %arg9: memref<128x32xbf16, #tpu.memory_space<vmem>>) attributes {dimension_semantics = [#tpu.dimension_semantics<parallel>], iteration_bounds = array<i64: 2>, scalar_prefetch = 0 : i64, scratch_operands = 0 : i64, tpu.core_type = #tpu.core_type<tc>, window_params = [{transform_indices = @transform_0, window_bounds = array<i64: 128, 256>}, {pipeline_mode = #tpu.pipeline_mode<synchronous>, transform_indices = @transform_1, window_bounds = array<i64: 256, 36>}, {transform_indices = @transform_2, window_bounds = array<i64: 128, 4>}, {transform_indices = @transform_3, window_bounds = array<i64: 128, 32>}, {pipeline_mode = #tpu.pipeline_mode<synchronous>, transform_indices = @transform_4, window_bounds = array<i64: 8, 96>}, {pipeline_mode = #tpu.pipeline_mode<synchronous>, transform_indices = @transform_5, window_bounds = array<i64: 64, 96>}, {pipeline_mode = #tpu.pipeline_mode<synchronous>, transform_indices = @transform_6, window_bounds = array<i64: 1, 96>}, {transform_indices = @transform_7, window_bounds = array<i64: 128, 96>}, {transform_indices = @transform_8, window_bounds = array<i64: 128, 32>}]} {
    %c0 = arith.constant 0 : index
    %c0_0 = arith.constant 0 : index
    %0 = vector.load %arg1[%c0, %c0_0] : memref<128x256xbf16, #tpu.memory_space<vmem>>, vector<128x256xbf16>
    %c0_1 = arith.constant 0 : index
    %c0_2 = arith.constant 0 : index
    %1 = vector.load %arg2[%c0_1, %c0_2] : memref<256x36xbf16, #tpu.memory_space<vmem>>, vector<256x36xbf16>
    %cst = arith.constant dense<0.000000e+00> : vector<128x36xf32>
    %2 = tpu.matmul %0, %1, %cst {dimension_numbers = #tpu.dot_dimension_numbers<[1], [0], [0], [1], [0, 0, 1, 1], [], []>} : vector<128x256xbf16>, vector<256x36xbf16>, vector<128x36xf32> -> vector<128x36xf32>
    %3 = vector.extract_strided_slice %2 {offsets = [0, 0], sizes = [128, 4], strides = [1, 1]} : vector<128x36xf32> to vector<128x4xf32>
    %4 = vector.extract_strided_slice %2 {offsets = [0, 4], sizes = [128, 32], strides = [1, 1]} : vector<128x36xf32> to vector<128x32xf32>
    %c0_3 = arith.constant 0 : index
    %c0_4 = arith.constant 0 : index
    %5 = vector.load %arg3[%c0_3, %c0_4] : memref<128x4xf32, #tpu.memory_space<vmem>>, vector<128x4xf32>
    %6 = tpu.concatenate %5, %3 in 1 : vector<128x4xf32>, vector<128x4xf32> -> vector<128x8xf32>
    %c0_5 = arith.constant 0 : index
    %c0_6 = arith.constant 0 : index
    %7 = vector.load %arg4[%c0_5, %c0_6] : memref<128x32xf32, #tpu.memory_space<vmem>>, vector<128x32xf32>
    %8 = tpu.concatenate %7, %4 in 1 : vector<128x32xf32>, vector<128x32xf32> -> vector<128x64xf32>
    %c0_7 = arith.constant 0 : index
    %c0_8 = arith.constant 0 : index
    %9 = vector.load %arg5[%c0_7, %c0_8] : memref<8x96xf32, #tpu.memory_space<vmem>>, vector<8x96xf32>
    %cst_9 = arith.constant dense<0.000000e+00> : vector<128x96xf32>
    %10 = tpu.matmul %6, %9, %cst_9 {dimension_numbers = #tpu.dot_dimension_numbers<[1], [0], [0], [1], [0, 0, 1, 1], [], []>} : vector<128x8xf32>, vector<8x96xf32>, vector<128x96xf32> -> vector<128x96xf32>
    %c0_10 = arith.constant 0 : index
    %c0_11 = arith.constant 0 : index
    %11 = vector.load %arg6[%c0_10, %c0_11] : memref<64x96xf32, #tpu.memory_space<vmem>>, vector<64x96xf32>
    %cst_12 = arith.constant dense<0.000000e+00> : vector<128x96xf32>
    %12 = tpu.matmul %8, %11, %cst_12 {dimension_numbers = #tpu.dot_dimension_numbers<[1], [0], [0], [1], [0, 0, 1, 1], [], []>} : vector<128x64xf32>, vector<64x96xf32>, vector<128x96xf32> -> vector<128x96xf32>
    %13 = arith.addf %10, %12 : vector<128x96xf32>
    %c0_13 = arith.constant 0 : index
    %c0_14 = arith.constant 0 : index
    %14 = vector.load %arg7[%c0_13, %c0_14] : memref<1x96xf32, #tpu.memory_space<vmem>>, vector<1x96xf32>
    %15 = vector.broadcast %14 : vector<1x96xf32> to vector<128x96xf32>
    %16 = arith.addf %13, %15 : vector<128x96xf32>
    %17 = vector.extract_strided_slice %16 {offsets = [0, 0], sizes = [128, 32], strides = [1, 1]} : vector<128x96xf32> to vector<128x32xf32>
    %18 = arith.negf %17 : vector<128x32xf32>
    %19 = math.exp %18 : vector<128x32xf32>
    %cst_15 = arith.constant 1.000000e+00 : f32
    %20 = vector.broadcast %cst_15 : f32 to vector<128x32xf32>
    %21 = arith.addf %20, %19 : vector<128x32xf32>
    %22 = arith.divf %20, %21 : vector<128x32xf32>
    %23 = vector.extract_strided_slice %16 {offsets = [0, 32], sizes = [128, 32], strides = [1, 1]} : vector<128x96xf32> to vector<128x32xf32>
    %24 = arith.negf %23 : vector<128x32xf32>
    %25 = math.exp %24 : vector<128x32xf32>
    %cst_16 = arith.constant 1.000000e+00 : f32
    %26 = vector.broadcast %cst_16 : f32 to vector<128x32xf32>
    %27 = arith.addf %26, %25 : vector<128x32xf32>
    %28 = arith.divf %26, %27 : vector<128x32xf32>
    %29 = vector.extract_strided_slice %16 {offsets = [0, 64], sizes = [128, 32], strides = [1, 1]} : vector<128x96xf32> to vector<128x32xf32>
    %c0_17 = arith.constant 0 : index
    %c0_18 = arith.constant 0 : index
    %30 = vector.load %arg4[%c0_17, %c0_18] : memref<128x32xf32, #tpu.memory_space<vmem>>, vector<128x32xf32>
    %31 = arith.mulf %30, %28 : vector<128x32xf32>
    %32 = tpu.concatenate %22, %29, %31 in 1 : vector<128x32xf32>, vector<128x32xf32>, vector<128x32xf32> -> vector<128x96xf32>
    %c0_19 = arith.constant 0 : index
    %c0_20 = arith.constant 0 : index
    %33 = vector.load %arg8[%c0_19, %c0_20] : memref<128x96xf32, #tpu.memory_space<vmem>>, vector<128x96xf32>
    tpu.vector_store %arg8[%c0_19, %c0_20], %32 {strides = array<i32>} : memref<128x96xf32, #tpu.memory_space<vmem>>, vector<128x96xf32>,
    %34 = arith.truncf %31 : vector<128x32xf32> to vector<128x32xbf16>
    %c0_21 = arith.constant 0 : index
    %c0_22 = arith.constant 0 : index
    %35 = vector.load %arg9[%c0_21, %c0_22] : memref<128x32xbf16, #tpu.memory_space<vmem>>, vector<128x32xbf16>
    tpu.vector_store %arg9[%c0_21, %c0_22], %34 {strides = array<i32>} : memref<128x32xbf16, #tpu.memory_space<vmem>>, vector<128x32xbf16>,
    return
  }
  func.func @transform_0(%arg0: i32) -> (i32, i32) {
    %c0_i32 = arith.constant 0 : i32
    %c0_i32_0 = arith.constant 0 : i32
    return %arg0, %c0_i32 : i32, i32
  }
  func.func @transform_1(%arg0: i32) -> (i32, i32) {
    %c0_i32 = arith.constant 0 : i32
    %c0_i32_0 = arith.constant 0 : i32
    %c0_i32_1 = arith.constant 0 : i32
    return %c0_i32, %c0_i32_0 : i32, i32
  }
  func.func @transform_2(%arg0: i32) -> (i32, i32) {
    %c0_i32 = arith.constant 0 : i32
    %c0_i32_0 = arith.constant 0 : i32
    return %arg0, %c0_i32 : i32, i32
  }
  func.func @transform_3(%arg0: i32) -> (i32, i32) {
    %c0_i32 = arith.constant 0 : i32
    %c0_i32_0 = arith.constant 0 : i32
    return %arg0, %c0_i32 : i32, i32
  }
  func.func @transform_4(%arg0: i32) -> (i32, i32) {
    %c0_i32 = arith.constant 0 : i32
    %c0_i32_0 = arith.constant 0 : i32
    %c0_i32_1 = arith.constant 0 : i32
    return %c0_i32, %c0_i32_0 : i32, i32
  }
  func.func @transform_5(%arg0: i32) -> (i32, i32) {
    %c0_i32 = arith.constant 0 : i32
    %c0_i32_0 = arith.constant 0 : i32
    %c0_i32_1 = arith.constant 0 : i32
    return %c0_i32, %c0_i32_0 : i32, i32
  }
  func.func @transform_6(%arg0: i32) -> (i32, i32) {
    %c0_i32 = arith.constant 0 : i32
    %c0_i32_0 = arith.constant 0 : i32
    %c0_i32_1 = arith.constant 0 : i32
    return %c0_i32, %c0_i32_0 : i32, i32
  }
  func.func @transform_7(%arg0: i32) -> (i32, i32) {
    %c0_i32 = arith.constant 0 : i32
    %c0_i32_0 = arith.constant 0 : i32
    return %arg0, %c0_i32 : i32, i32
  }
  func.func @transform_8(%arg0: i32) -> (i32, i32) {
    %c0_i32 = arith.constant 0 : i32
    %c0_i32_0 = arith.constant 0 : i32
    return %arg0, %c0_i32 : i32, i32
  }
}

</mosaic_0001>

<bundles_post_ra>
// kernel: tpu_custom_call.1
= control target key start
LH: loop header
LB: loop body
LE: loop exit
PB: predicated region body
PF: predicated region fallthrough
CT: control target
= control target key end

     0   :  { %s2346_s27 = smov 0   ;;  %s2962_s0 = inlined_call_operand.vmem [shape: bf16[256,256], index: 0, kind: input, shape index: {}]   ;;  %s2963_s1 = inlined_call_operand.vmem [shape: bf16[256,36], index: 1, kind: input, shape index: {}]   ;;  %s2964_s2 = inlined_call_operand.vmem [shape: f32[256,4], index: 2, kind: input, shape index: {}]   ;;  %s2965_s3 = inlined_call_operand.vmem [shape: f32[256,32], index: 3, kind: input, shape index: {}]   ;;  %s2966_s4 = inlined_call_operand.vmem [shape: f32[8,96], index: 4, kind: input, shape index: {}]   ;;  %s2967_s5 = inlined_call_operand.vmem [shape: f32[64,96], index: 5, kind: input, shape index: {}]   ;;  %s2968_s6 = inlined_call_operand.vmem [shape: f32[1,96], index: 6, kind: input, shape index: {}]   ;;  %s2969_s7 = inlined_call_operand.vmem [shape: f32[256,96], index: 7, kind: output, shape index: {0}]   ;;  %s2970_s8 = inlined_call_operand.vmem [shape: bf16[256,32], index: 8, kind: output, shape index: {1}]  }
   0x1 LB: > { %s1838_s28 = sadd.s32 4294967295, %s2295_s27   ;;  %p1842_p0 = scmp.ge.s32.totalorder %s2295_s27, 1  ;;  %s2295_s27 = sphi %s2346_s27, %s19_s27  }
   0x2   : > { %p289_p1 = scmp.lt.s32.totalorder %s2295_s27, 3 }
   0x4   : > { %p290_p2 = pnand %p1842_p0, %p289_p1 }
   0x5   : > { %v2185_v0 = vld [vmem:[%s2963_s1 + $0x40] sm:$0xff] (!%p290_p2)   ;;  %s1843_s9 = sshll.u32 (!%p290_p2), %s1838_s28, 4  ;;  %v2187_v2 = vld [vmem:[%s2963_s1 + $0x48] sm:$0xff] (!%p290_p2)   ;;  %v2189_v4 = vld [vmem:[%s2963_s1 + $0x50] sm:$0xff] (!%p290_p2)   ;;  %s2297_s21 = smov (!%p290_p2), 28   ;;  %vm853_vm0 = vcmask (!%p290_p2), 261120  }
   0x6   : > { %293 = sbr.rel (%p290_p2) target bundleno = 936 (0x3a8), region = 48  ;;  %v2186_v1 = vld [vmem:[%s2963_s1] sm:$0xff] (!%p290_p2)   ;;  %1970 = vmatprep.subr.bf16.mxu0 (!%p290_p2), %v2185_v0  ;;  %v2188_v3 = vld [vmem:[%s2963_s1 + $0x8] sm:$0xff] (!%p290_p2)   ;;  %p340_p3 = scmp.lt.s32.totalorder (!%p290_p2), %s1843_s9, 31  ;;  %v2190_v5 = vld [vmem:[%s2963_s1 + $0x10] sm:$0xff] (!%p290_p2)   ;;  %vm879_vm1 = vcmask (!%p290_p2), 523264  }
   0x7   : > { %1971 = vmatpush3.bf16.msra.mxu0 (!%p290_p2), %v2186_v1  ;;  %v2191_v6 = vld [vmem:[%s2963_s1 + $0x58] sm:$0xff] (!%p290_p2)   ;;  %v2193_v8 = vld [vmem:[%s2963_s1 + $0x60] sm:$0xff] (!%p290_p2)   ;;  %v2195_v10 = vld [vmem:[%s2963_s1 + $0x68] sm:$0xff] (!%p290_p2)   ;;  %s2298_s25 = smov (!%p290_p2), 4   ;;  %vm772_vm2 = vcmask (!%p290_p2), 31744   ;;  %vm1073_vm3 = vcmask (!%p290_p2), 64512  }
   0x8   : > { %1972 = vmatprep.subr.bf16.mxu0 (!%p290_p2), %v2187_v2  ;;  %v2192_v7 = vld [vmem:[%s2963_s1 + $0x18] sm:$0xff] (!%p290_p2)   ;;  %v2194_v9 = vld [vmem:[%s2963_s1 + $0x20] sm:$0xff] (!%p290_p2)   ;;  %v2196_v12 = vld [vmem:[%s2963_s1 + $0x28] sm:$0xff] (!%p290_p2)   ;;  %s2299_s14 = smov (!%p290_p2), 96   ;;  %vm1707_vm4 = vcmask (!%p290_p2), 257024   ;;  %s2300_s19 = smov (!%p290_p2), 64  }
   0x9   : > { %v2197_v13 = vld [vmem:[%s2963_s1 + $0x70] sm:$0xff] (!%p290_p2)   ;;  %v2199_v15 = vld [vmem:[%s2963_s1 + $0x78] sm:$0xff] (!%p290_p2)   ;;  %v871_v32 = vld [vmem:[%s2967_s5] sm:$0xff] (!%p290_p2)  ;;  %vm1626_vm5 = vcmask (!%p290_p2), 785408  }
   0xa   : > { %v2198_v14 = vld [vmem:[%s2963_s1 + $0x30] sm:$0xff] (!%p290_p2)   ;;  %v2200_v16 = vld [vmem:[%s2963_s1 + $0x38] sm:$0xff] (!%p290_p2)   ;;  %v872_v33 = vld [vmem:[%s2967_s5 + $0x8] sm:$0xff] (!%p290_p2) }
   0xb   : > { %1973 = vmatpush3.bf16.msra.mxu0 (!%p290_p2), %v2188_v3  ;;  %v873_v34 = vld [vmem:[%s2967_s5 + $0x10] sm:$0xff] (!%p290_p2)  ;;  %v2141_v35 = vpack.c.bf16 (!%p290_p2), %v872_v33, %v871_v32  ;;  %v874_v36 = vld [vmem:[%s2967_s5 + $0x18] sm:$0xff] (!%p290_p2)  ;;  %v875_v38 = vld [vmem:[%s2967_s5 + $0x20] sm:$0xff] (!%p290_p2) }
   0xc   : > { %1974 = vmatprep.subr.bf16.mxu0 (!%p290_p2), %v2189_v4  ;;  %v2145_v37 = vpack.c.bf16 (!%p290_p2), %v874_v36, %v873_v34  ;;  %v876_v39 = vld [vmem:[%s2967_s5 + $0x28] sm:$0xff] (!%p290_p2)  ;;  %v877_v41 = vld [vmem:[%s2967_s5 + $0x30] sm:$0xff] (!%p290_p2)  ;;  %v878_v42 = vld [vmem:[%s2967_s5 + $0x38] sm:$0xff] (!%p290_p2) }
   0xd   : > { %s2972_s9 = smov (!%p340_p3, %s1843_s9), 31  ;;  %2142 = vmatprep.subr.bf16.mxu1 %v2141_v35  ;;  %v2149_v40 = vpack.c.bf16 %v876_v39, %v875_v38  ;;  %v2153_v43 = vpack.c.bf16 %v878_v42, %v877_v41  ;;  %v2466_v60 = vld [vmem:[%s2966_s4] sm:$0xff] }
   0xe   : > { %s2381_s24 = sshll.u32 %s2972_s9, 3  ;;  %2144 = vmatpush3.bf16.msra.mxu1 %v2141_v35  ;;  %s1853_s15 = sshll.u32 %s2972_s9, 2 }
   0xf   : > { %1975 = vmatpush3.bf16.msra.mxu0 %v2190_v5  ;;  %s2390_s30 = scalar_lea.vmem %s2962_s0, %s2381_s24  ;;  %2146 = vmatprep.subr.bf16.mxu1 %v2145_v37  ;;  %s2487_s29 = scalar_lea.vmem %s2965_s3, %s2381_s24 }
  0x10   : > { %1976 = vmatprep.subr.bf16.mxu0 %v2191_v6  ;;  %v2203_v11 = vld [vmem:[%s2390_s30 + $0x4] ss:$8 sps:$4 sm:$0xff]   ;;  %v2201_v17 = vld [vmem:[%s2390_s30] ss:$8 sps:$4 sm:$0xff]   ;;  %v2204_v18 = vld [vmem:[%s2390_s30 + $0x14] ss:$8 sps:$4 sm:$0xff]   ;;  %s2581_s12 = scalar_lea.vmem %s2964_s2, %s2381_s24  ;;  %s2806_s18 = scalar_lea.vmem %s2970_s8, %s1853_s15 }
  0x11   : > { %627 = vmatprep.mubr.bf16.mxu0 %v2203_v11  ;;  %v2206_v19 = vld [vmem:[%s2390_s30 + $0x10] ss:$8 sps:$4 sm:$0xff]   ;;  %v2207_v20 = vld [vmem:[%s2390_s30 + $0x24] ss:$8 sps:$4 sm:$0xff]   ;;  %v2209_v21 = vld [vmem:[%s2390_s30 + $0x20] ss:$8 sps:$4 sm:$0xff]  }
  0x12   : > { %v2210_v22 = vld [vmem:[%s2390_s30 + $0x34] ss:$8 sps:$4 sm:$0xff]   ;;  %v2212_v23 = vld [vmem:[%s2390_s30 + $0x30] ss:$8 sps:$4 sm:$0xff]   ;;  %v2213_v24 = vld [vmem:[%s2390_s30 + $0x44] ss:$8 sps:$4 sm:$0xff]   ;;  %2148 = vmatpush3.bf16.msra.mxu1 %v2145_v37 }
  0x13   : > { %1977 = vmatpush3.bf16.msra.mxu0 %v2192_v7  ;;  %v2215_v25 = vld [vmem:[%s2390_s30 + $0x40] ss:$8 sps:$4 sm:$0xff]   ;;  %v2216_v26 = vld [vmem:[%s2390_s30 + $0x54] ss:$8 sps:$4 sm:$0xff]   ;;  %v2218_v27 = vld [vmem:[%s2390_s30 + $0x50] ss:$8 sps:$4 sm:$0xff]   ;;  %2150 = vmatprep.subr.bf16.mxu1 %v2149_v40 }
  0x14   : > { %1978 = vmatprep.subr.bf16.mxu0 %v2193_v8  ;;  %v2219_v28 = vld [vmem:[%s2390_s30 + $0x64] ss:$8 sps:$4 sm:$0xff]   ;;  %v2221_v29 = vld [vmem:[%s2390_s30 + $0x60] ss:$8 sps:$4 sm:$0xff]   ;;  %v2222_v30 = vld [vmem:[%s2390_s30 + $0x74] ss:$8 sps:$4 sm:$0xff]  }
  0x15   : > { %v2224_v31 = vld [vmem:[%s2390_s30 + $0x70] ss:$8 sps:$4 sm:$0xff]   ;;  %v2496_v32 = vld [vmem:[%s2487_s29 + $0x8] sm:$0xff]  ;;  %v2515_v41 = vld [vmem:[%s2487_s29 + $0x20] sm:$0xff] }
  0x16   : > { %2152 = vmatpush3.bf16.msra.mxu1 %v2149_v40  ;;  %v2502_v35 = vld [vmem:[%s2487_s29 + $0x10] sm:$0xff]  ;;  %v2509_v38 = vld [vmem:[%s2487_s29 + $0x18] sm:$0xff] }
  0x17   : > { %1979 = vmatpush3.bf16.msra.mxu0 %v2194_v9  ;;  %2154 = vmatprep.subr.bf16.mxu1 %v2153_v43 }
  0x18   : > { %1980 = vmatprep.subr.bf16.mxu0 %v2195_v10 }
  0x1a   : > { %2156 = vmatpush3.bf16.msra.mxu1 %v2153_v43  ;;  %v2518_v43 = vld [vmem:[%s2487_s29 + $0x28] sm:$0xff] }
  0x1b   : > { %1981 = vmatpush3.bf16.msra.mxu0 %v2196_v12  ;;  %2115 = vmatprep.subr.mxu1 %v2466_v60 }
  0x1c   : > { %1982 = vmatprep.subr.bf16.mxu0 %v2197_v13 }
  0x1f   : > { %1983 = vmatpush3.bf16.msra.mxu0 %v2198_v14 }
  0x20   : > { %1984 = vmatprep.subr.bf16.mxu0 %v2199_v15 }
  0x23   : > { %1985 = vmatpush3.bf16.msra.mxu0 %v2200_v16 }
  0x26   : > { %628 = vmatmul.mubr.bf16.vlgmr.msra.gmra.mrb[0].mxu0 %v2201_v17 }
  0x27   : > { %635 = vmatprep.mubr.bf16.mxu0 %v2204_v18 }
  0x2e   : > { %636 = vmatmul.mubr.bf16.gmra.mrb[4].mxu0 %v2206_v19 }
  0x2f   : > { %643 = vmatprep.mubr.bf16.mxu0 %v2207_v20 }
  0x36   : > { %644 = vmatmul.mubr.bf16.gmra.mrb[8].mxu0 %v2209_v21 }
  0x37   : > { %651 = vmatprep.mubr.bf16.mxu0 %v2210_v22 }
  0x3e   : > { %652 = vmatmul.mubr.bf16.gmra.mrb[12].mxu0 %v2212_v23 }
  0x3f   : > { %659 = vmatprep.mubr.bf16.mxu0 %v2213_v24 }
  0x46   : > { %660 = vmatmul.mubr.bf16.gmra.mrb[16].mxu0 %v2215_v25 }
  0x47   : > { %667 = vmatprep.mubr.bf16.mxu0 %v2216_v26 }
  0x4e   : > { %668 = vmatmul.mubr.bf16.gmra.mrb[20].mxu0 %v2218_v27 }
  0x4f   : > { %675 = vmatprep.mubr.bf16.mxu0 %v2219_v28 }
  0x56   : > { %676 = vmatmul.mubr.bf16.gmra.mrb[24].mxu0 %v2221_v29  ;;  %v2490_v29 = vld [vmem:[%s2487_s29] sm:$0xff] }
  0x57   : > { %683 = vmatprep.mubr.bf16.mxu0 %v2222_v30 }
  0x5e   : > { %684 = vmatmul.mubr.bf16.gmra.mrb[28].mxu0 %v2224_v31 }
  0xf9   : > { %v1986_v44 = vpop.f32.mrb[0].mxu0 }
  0xfa   : > { %v1987_v45 = vpop.f32.mrb[1].mxu0 }
  0xfb   : > { %v2453_v46 = vadd.f32 %v1987_v45, %v1986_v44  ;;  %v1989_v47 = vpop.f32.mrb[2].mxu0 }
  0xfc   : > { %v1990_v48 = vpop.f32.mrb[3].mxu0 }
  0xfd   : > { %v2455_v49 = vadd.f32 %v1990_v48, %v1989_v47  ;;  %805 = vrot.lane.b32.xlu0 %v2453_v46, %s2297_s21  ;;  %v2527_v47 = vld [vmem:[%s2487_s29 + $0x30] sm:$0xff] }
 0x101   : > { %v1992_v50 = vpop.f32.mrb[4].mxu0  ;;  %807 = vrot.lane.b32.xlu0 %v2455_v49, %s2297_s21 }
 0x102   : > { %v1993_v51 = vpop.f32.mrb[5].mxu0 }
 0x103   : > { %v1994_v52 = vadd.f32 %v1993_v51, %v1992_v50  ;;  %v1995_v53 = vpop.f32.mrb[6].mxu0 }
 0x104   : > { %v1996_v54 = vpop.f32.mrb[7].mxu0 }
 0x105   : > { %v1997_v55 = vadd.f32 %v1996_v54, %v1995_v53  ;;  %809 = vrot.lane.b32.xlu1 %v1994_v52, %s2297_s21  ;;  %v2539_v53 = vld [vmem:[%s2487_s29 + $0x40] sm:$0xff] }
 0x109   : > { %v1998_v56 = vpop.f32.mrb[8].mxu0  ;;  %811 = vrot.lane.b32.xlu1 %v1997_v55, %s2297_s21 }
 0x10a   : > { %v1999_v57 = vpop.f32.mrb[9].mxu0 }
 0x10b   : > { %v2000_v58 = vadd.f32 %v1999_v57, %v1998_v56  ;;  %v2001_v59 = vpop.f32.mrb[10].mxu0 }
 0x10c   : > { %v2002_v61 = vpop.f32.mrb[11].mxu0 }
 0x10d   : > { %v2003_v62 = vadd.f32 %v2002_v61, %v2001_v59  ;;  %813 = vrot.lane.b32.xlu0 %v2000_v58, %s2297_s21  ;;  %v2551_v59 = vld [vmem:[%s2487_s29 + $0x50] sm:$0xff]  ;;  %v2554_v61 = vld [vmem:[%s2487_s29 + $0x58] sm:$0xff] }
 0x10f   : > { %815 = vrot.lane.b32.xlu1 %v2003_v62, %s2297_s21 }
 0x111   : > { %v2004_v63 = vpop.f32.mrb[12].mxu0 }
 0x112   : > { %v2005_v0 = vpop.f32.mrb[13].mxu0 }
 0x113   : > { %v2006_v1 = vadd.f32 %v2005_v0, %v2004_v63  ;;  %v2007_v2 = vpop.f32.mrb[14].mxu0 }
 0x114   : > { %v2008_v3 = vpop.f32.mrb[15].mxu0 }
 0x115   : > { %v2009_v4 = vadd.f32 %v2008_v3, %v2007_v2  ;;  %817 = vrot.lane.b32.xlu0 %v2006_v1, %s2297_s21  ;;  %v2566_v3 = vld [vmem:[%s2487_s29 + $0x68] sm:$0xff] }
 0x117   : > { %819 = vrot.lane.b32.xlu1 %v2009_v4, %s2297_s21 }
 0x119   : > { %v2010_v5 = vpop.f32.mrb[16].mxu0 }
 0x11a   : > { %v2011_v6 = vpop.f32.mrb[17].mxu0 }
 0x11b   : > { %v2012_v7 = vadd.f32 %v2011_v6, %v2010_v5  ;;  %v2013_v8 = vpop.f32.mrb[18].mxu0 }
 0x11c   : > { %v2014_v9 = vpop.f32.mrb[19].mxu0 }
 0x11d   : > { %v2015_v10 = vadd.f32 %v2014_v9, %v2013_v8  ;;  %821 = vrot.lane.b32.xlu0 %v2012_v7, %s2297_s21  ;;  %v2584_v9 = vld [vmem:[%s2487_s29 + $0x78] sm:$0xff] }
 0x11f   : > { %823 = vrot.lane.b32.xlu1 %v2015_v10, %s2297_s21 }
 0x121   : > { %v2016_v11 = vpop.f32.mrb[20].mxu0 }
 0x122   : > { %v2017_v12 = vpop.f32.mrb[21].mxu0 }
 0x123   : > { %v2018_v13 = vadd.f32 %v2017_v12, %v2016_v11  ;;  %v2019_v14 = vpop.f32.mrb[22].mxu0  ;;  %v692_v12 = vld [vmem:[%s2581_s12] sm:$0xff] }
 0x124   : > { %v2020_v15 = vpop.f32.mrb[23].mxu0 }
 0x125   : > { %v2021_v16 = vadd.f32 %v2020_v15, %v2019_v14  ;;  %825 = vrot.lane.b32.xlu0 %v2018_v13, %s2297_s21  ;;  %v693_v15 = vld [vmem:[%s2581_s12 + $0x8] sm:$0xff] }
 0x127   : > { %827 = vrot.lane.b32.xlu1 %v2021_v16, %s2297_s21 }
 0x129   : > { %v2022_v17 = vpop.f32.mrb[24].mxu0 }
 0x12a   : > { %v2023_v18 = vpop.f32.mrb[25].mxu0 }
 0x12b   : > { %v2024_v19 = vadd.f32 %v2023_v18, %v2022_v17  ;;  %v2025_v20 = vpop.f32.mrb[26].mxu0  ;;  %v694_v18 = vld [vmem:[%s2581_s12 + $0x10] sm:$0xff] }
 0x12c   : > { %v2026_v21 = vpop.f32.mrb[27].mxu0 }
 0x12d   : > { %v2027_v22 = vadd.f32 %v2026_v21, %v2025_v20  ;;  %829 = vrot.lane.b32.xlu0 %v2024_v19, %s2297_s21  ;;  %v695_v21 = vld [vmem:[%s2581_s12 + $0x18] sm:$0xff] }
 0x12f   : > { %831 = vrot.lane.b32.xlu1 %v2027_v22, %s2297_s21 }
 0x131   : > { %v2028_v23 = vpop.f32.mrb[28].mxu0 }
 0x132   : > { %v2029_v24 = vpop.f32.mrb[29].mxu0 }
 0x133   : > { %v2030_v25 = vadd.f32 %v2029_v24, %v2028_v23  ;;  %v2031_v26 = vpop.f32.mrb[30].mxu0  ;;  %v696_v24 = vld [vmem:[%s2581_s12 + $0x20] sm:$0xff] }
 0x134   : > { %v2032_v27 = vpop.f32.mrb[31].mxu0 }
 0x135   : > { %v2033_v28 = vadd.f32 %v2032_v27, %v2031_v26  ;;  %833 = vrot.lane.b32.xlu0 %v2030_v25, %s2297_s21  ;;  %v697_v27 = vld [vmem:[%s2581_s12 + $0x28] sm:$0xff] }
 0x137   : > { %835 = vrot.lane.b32.xlu1 %v2033_v28, %s2297_s21  ;;  %s2875_s21 = scalar_lea.vmem %s2969_s7, %s2381_s24 }
 0x139   : > { %724 = vrot.lane.b32.xlu0 %v2453_v46, %s2298_s25 }
 0x13b   : > { %726 = vrot.lane.b32.xlu1 %v2455_v49, %s2298_s25  ;;  %v2530_v49 = vld [vmem:[%s2487_s29 + $0x38] sm:$0xff] }
 0x13d   : > { %728 = vrot.lane.b32.xlu0 %v1994_v52, %s2298_s25 }
 0x13f   : > { %730 = vrot.lane.b32.xlu1 %v1997_v55, %s2298_s25  ;;  %v2542_v55 = vld [vmem:[%s2487_s29 + $0x48] sm:$0xff] }
 0x141   : > { %732 = vrot.lane.b32.xlu0 %v2000_v58, %s2298_s25 }
 0x143   : > { %734 = vrot.lane.b32.xlu1 %v2003_v62, %s2298_s25 }
 0x145   : > { %736 = vrot.lane.b32.xlu0 %v2006_v1, %s2298_s25  ;;  %v2563_v1 = vld [vmem:[%s2487_s29 + $0x60] sm:$0xff] }
 0x147   : > { %738 = vrot.lane.b32.xlu1 %v2009_v4, %s2298_s25 }
 0x149   : > { %740 = vrot.lane.b32.xlu0 %v2012_v7, %s2298_s25  ;;  %v2575_v7 = vld [vmem:[%s2487_s29 + $0x70] sm:$0xff] }
 0x14b   : > { %742 = vrot.lane.b32.xlu1 %v2015_v10, %s2298_s25 }
 0x14d   : > { %744 = vrot.lane.b32.xlu0 %v2018_v13, %s2298_s25 }
 0x14f   : > { %746 = vrot.lane.b32.xlu1 %v2021_v16, %s2298_s25 }
 0x151   : > { %748 = vrot.lane.b32.xlu0 %v2024_v19, %s2298_s25 }
 0x153   : > { %750 = vrot.lane.b32.xlu1 %v2027_v22, %s2298_s25 }
 0x155   : > { %752 = vrot.lane.b32.xlu0 %v2030_v25, %s2298_s25 }
 0x157   : > { %754 = vrot.lane.b32.xlu1 %v2033_v28, %s2298_s25 }
 0x16f   : > { %v806_v30 = vpop.permute.xlu0 %805 }
 0x170   : > { %v854_v31 = vsel %vm853_vm0, %v2490_v29, %v806_v30 }
 0x171   : > { %2091 = vmatprep.mubr.msk.f32.mxu1 %vm879_vm1, %v854_v31  ;;  %v698_v31 = vld [vmem:[%s2581_s12 + $0x30] sm:$0xff] }
 0x173   : > { %v808_v33 = vpop.permute.xlu0 %807 }
 0x174   : > { %v855_v34 = vsel %vm853_vm0, %v2496_v32, %v808_v33 }
 0x175   : > { %2092 = vmatmul.mubr.msk.f32.vlgmr.msra.gmra.mrb[0].mxu1 %vm879_vm1, %v855_v34 }
 0x176   : > { %2116 = vmatpush3.msra.mxu1 %v2466_v60 }
 0x177   : > { %v810_v36 = vpop.permute.xlu1 %809 }
 0x178   : > { %v856_v37 = vsel %vm853_vm0, %v2502_v35, %v810_v36  ;;  %v699_v36 = vld [vmem:[%s2581_s12 + $0x38] sm:$0xff] }
 0x179   : > { %2094 = vmatprep.mubr.msk.f32.mxu1 %vm879_vm1, %v856_v37 }
 0x17b   : > { %v812_v39 = vpop.permute.xlu1 %811 }
 0x17c   : > { %v857_v40 = vsel %vm853_vm0, %v2509_v38, %v812_v39 }
 0x17d   : > { %2095 = vmatmul.mubr.msk.f32.gmra.mrb[2].mxu1 %vm879_vm1, %v857_v40  ;;  %v700_v40 = vld [vmem:[%s2581_s12 + $0x40] sm:$0xff] }
 0x17f   : > { %v814_v42 = vpop.permute.xlu0 %813 }
 0x180   : > { %v858_v44 = vsel %vm853_vm0, %v2515_v41, %v814_v42 }
 0x181   : > { %v816_v45 = vpop.permute.xlu1 %815  ;;  %2097 = vmatprep.mubr.msk.f32.mxu1 %vm879_vm1, %v858_v44 }
 0x182   : > { %v859_v46 = vsel %vm853_vm0, %v2518_v43, %v816_v45  ;;  %v701_v45 = vld [vmem:[%s2581_s12 + $0x48] sm:$0xff] }
 0x183   : > { %2098 = vmatmul.mubr.msk.f32.gmra.mrb[4].mxu1 %vm879_vm1, %v859_v46 }
 0x187   : > { %v818_v48 = vpop.permute.xlu0 %817 }
 0x188   : > { %v860_v50 = vsel %vm853_vm0, %v2527_v47, %v818_v48 }
 0x189   : > { %v820_v51 = vpop.permute.xlu1 %819  ;;  %2100 = vmatprep.mubr.msk.f32.mxu1 %vm879_vm1, %v860_v50  ;;  %v702_v50 = vld [vmem:[%s2581_s12 + $0x50] sm:$0xff] }
 0x18a   : > { %v861_v52 = vsel %vm853_vm0, %v2530_v49, %v820_v51 }
 0x18b   : > { %2101 = vmatmul.mubr.msk.f32.gmra.mrb[6].mxu1 %vm879_vm1, %v861_v52 }
 0x18f   : > { %v822_v54 = vpop.permute.xlu0 %821 }
 0x190   : > { %v862_v56 = vsel %vm853_vm0, %v2539_v53, %v822_v54  ;;  %v703_v54 = vld [vmem:[%s2581_s12 + $0x58] sm:$0xff] }
 0x191   : > { %v824_v57 = vpop.permute.xlu1 %823  ;;  %2103 = vmatprep.mubr.msk.f32.mxu1 %vm879_vm1, %v862_v56 }
 0x192   : > { %v863_v58 = vsel %vm853_vm0, %v2542_v55, %v824_v57 }
 0x193   : > { %2104 = vmatmul.mubr.msk.f32.gmra.mrb[8].mxu1 %vm879_vm1, %v863_v58  ;;  %v704_v58 = vld [vmem:[%s2581_s12 + $0x60] sm:$0xff] }
 0x197   : > { %v826_v60 = vpop.permute.xlu0 %825 }
 0x198   : > { %v864_v62 = vsel %vm853_vm0, %v2551_v59, %v826_v60 }
 0x199   : > { %v828_v63 = vpop.permute.xlu1 %827  ;;  %2106 = vmatprep.mubr.msk.f32.mxu1 %vm879_vm1, %v864_v62 }
 0x19a   : > { %v865_v0 = vsel %vm853_vm0, %v2554_v61, %v828_v63  ;;  %v705_v63 = vld [vmem:[%s2581_s12 + $0x68] sm:$0xff] }
 0x19b   : > { %2107 = vmatmul.mubr.msk.f32.gmra.mrb[10].mxu1 %vm879_vm1, %v865_v0 }
 0x19f   : > { %v830_v2 = vpop.permute.xlu0 %829 }
 0x1a0   : > { %v866_v4 = vsel %vm853_vm0, %v2563_v1, %v830_v2 }
 0x1a1   : > { %v832_v5 = vpop.permute.xlu1 %831  ;;  %2109 = vmatprep.mubr.msk.f32.mxu1 %vm879_vm1, %v866_v4  ;;  %v706_v4 = vld [vmem:[%s2581_s12 + $0x70] sm:$0xff] }
 0x1a2   : > { %v867_v6 = vsel %vm853_vm0, %v2566_v3, %v832_v5 }
 0x1a3   : > { %2110 = vmatmul.mubr.msk.f32.gmra.mrb[12].mxu1 %vm879_vm1, %v867_v6 }
 0x1a7   : > { %v834_v8 = vpop.permute.xlu0 %833 }
 0x1a8   : > { %v868_v10 = vsel %vm853_vm0, %v2575_v7, %v834_v8  ;;  %v707_v8 = vld [vmem:[%s2581_s12 + $0x78] sm:$0xff] }
 0x1a9   : > { %v836_v11 = vpop.permute.xlu1 %835  ;;  %2112 = vmatprep.mubr.msk.f32.mxu1 %vm879_vm1, %v868_v10 }
 0x1aa   : > { %v869_v13 = vsel %vm853_vm0, %v2584_v9, %v836_v11 }
 0x1ab   : > { %2113 = vmatmul.mubr.msk.f32.gmra.mrb[14].mxu1 %vm879_vm1, %v869_v13  ;;  %v725_v14 = vpop.permute.xlu0 %724  ;;  %v2643_v13 = vld [vmem:[%s2968_s6] ss:$0 sm:$0xff] }
 0x1ac   : > { %v773_v16 = vsel %vm772_vm2, %v692_v12, %v725_v14 }
 0x1ad   : > { %v727_v17 = vpop.permute.xlu1 %726  ;;  %2117 = vmatprep.mubr.msk.f32.mxu1 %vm1073_vm3, %v773_v16 }
 0x1ae   : > { %v774_v19 = vsel %vm772_vm2, %v693_v15, %v727_v17 }
 0x1af   : > { %2118 = vmatmul.mubr.msk.f32.vlgmr.msra.gmra.mrb[0].mxu1 %vm1073_vm3, %v774_v19  ;;  %v729_v20 = vpop.permute.xlu0 %728 }
 0x1b0   : > { %v775_v22 = vsel %vm772_vm2, %v694_v18, %v729_v20 }
 0x1b1   : > { %v731_v23 = vpop.permute.xlu1 %730  ;;  %2120 = vmatprep.mubr.msk.f32.mxu1 %vm1073_vm3, %v775_v22 }
 0x1b2   : > { %v776_v25 = vsel %vm772_vm2, %v695_v21, %v731_v23 }
 0x1b3   : > { %2121 = vmatmul.mubr.msk.f32.gmra.mrb[2].mxu1 %vm1073_vm3, %v776_v25  ;;  %v733_v26 = vpop.permute.xlu0 %732 }
 0x1b4   : > { %v777_v28 = vsel %vm772_vm2, %v696_v24, %v733_v26 }
 0x1b5   : > { %v735_v30 = vpop.permute.xlu1 %734  ;;  %2123 = vmatprep.mubr.msk.f32.mxu1 %vm1073_vm3, %v777_v28 }
 0x1b6   : > { %v778_v33 = vsel %vm772_vm2, %v697_v27, %v735_v30 }
 0x1b7   : > { %2124 = vmatmul.mubr.msk.f32.gmra.mrb[4].mxu1 %vm1073_vm3, %v778_v33  ;;  %v737_v34 = vpop.permute.xlu0 %736 }
 0x1b8   : > { %v779_v37 = vsel %vm772_vm2, %v698_v31, %v737_v34 }
 0x1b9   : > { %v739_v39 = vpop.permute.xlu1 %738  ;;  %2126 = vmatprep.mubr.msk.f32.mxu1 %vm1073_vm3, %v779_v37 }
 0x1ba   : > { %v780_v42 = vsel %vm772_vm2, %v699_v36, %v739_v39 }
 0x1bb   : > { %2127 = vmatmul.mubr.msk.f32.gmra.mrb[6].mxu1 %vm1073_vm3, %v780_v42  ;;  %v741_v44 = vpop.permute.xlu0 %740 }
 0x1bc   : > { %v781_v46 = vsel %vm772_vm2, %v700_v40, %v741_v44 }
 0x1bd   : > { %v743_v48 = vpop.permute.xlu1 %742  ;;  %2129 = vmatprep.mubr.msk.f32.mxu1 %vm1073_vm3, %v781_v46 }
 0x1be   : > { %v782_v51 = vsel %vm772_vm2, %v701_v45, %v743_v48 }
 0x1bf   : > { %2130 = vmatmul.mubr.msk.f32.gmra.mrb[8].mxu1 %vm1073_vm3, %v782_v51  ;;  %v745_v52 = vpop.permute.xlu0 %744 }
 0x1c0   : > { %v783_v56 = vsel %vm772_vm2, %v702_v50, %v745_v52 }
 0x1c1   : > { %v747_v57 = vpop.permute.xlu1 %746  ;;  %2132 = vmatprep.mubr.msk.f32.mxu1 %vm1073_vm3, %v783_v56 }
 0x1c2   : > { %v784_v60 = vsel %vm772_vm2, %v703_v54, %v747_v57 }
 0x1c3   : > { %2133 = vmatmul.mubr.msk.f32.gmra.mrb[10].mxu1 %vm1073_vm3, %v784_v60  ;;  %v749_v62 = vpop.permute.xlu0 %748 }
 0x1c4   : > { %v785_v0 = vsel %vm772_vm2, %v704_v58, %v749_v62 }
 0x1c5   : > { %v751_v2 = vpop.permute.xlu1 %750  ;;  %2135 = vmatprep.mubr.msk.f32.mxu1 %vm1073_vm3, %v785_v0 }
 0x1c6   : > { %v786_v5 = vsel %vm772_vm2, %v705_v63, %v751_v2 }
 0x1c7   : > { %2136 = vmatmul.mubr.msk.f32.gmra.mrb[12].mxu1 %vm1073_vm3, %v786_v5  ;;  %v753_v6 = vpop.permute.xlu0 %752 }
 0x1c8   : > { %v787_v10 = vsel %vm772_vm2, %v706_v4, %v753_v6 }
 0x1c9   : > { %v755_v11 = vpop.permute.xlu1 %754  ;;  %2138 = vmatprep.mubr.msk.f32.mxu1 %vm1073_vm3, %v787_v10 }
 0x1ca   : > { %v788_v12 = vsel %vm772_vm2, %v707_v8, %v755_v11 }
 0x1cb   : > { %2139 = vmatmul.mubr.msk.f32.gmra.mrb[14].mxu1 %vm1073_vm3, %v788_v12 }
 0x282   : > { %v2119_v14 = vpop.f32.mrb[0].mxu1 }
 0x283   : > { %v1275_v15 = vadd.f32 %v2119_v14, %v2643_v13  ;;  %v1188_v16 = vpop.f32.mrb[1].mxu1 }
 0x284   : > { %v1274_v17 = vadd.f32 %v2643_v13, %v1188_v16 }
 0x285   : > { %v1920_v18 = vmul.f32 -1.442695, %v1275_v15  ;;  %1484 = vrot.lane.b32.xlu1 %v1275_v15, %s2299_s14 }
 0x286   : > { %v1919_v19 = vmul.f32 -1.442695, %v1274_v17  ;;  %1482 = vrot.lane.b32.xlu0 %v1274_v17, %s2299_s14  ;;  %v2122_v20 = vpop.f32.mrb[2].mxu1 }
 0x287   : > { %2225 = vpow2.f32 %v1920_v18  ;;  %v2650_v21 = vadd.f32 %v2122_v20, %v2643_v13  ;;  %v1198_v22 = vpop.f32.mrb[3].mxu1 }
 0x288   : > { %2227 = vpow2.f32 %v1919_v19  ;;  %v2653_v23 = vadd.f32 %v2643_v13, %v1198_v22 }
 0x289   : > { %v1922_v24 = vmul.f32 -1.442695, %v2650_v21 }
 0x28a   : > { %v1921_v25 = vmul.f32 -1.442695, %v2653_v23  ;;  %v2125_v26 = vpop.f32.mrb[4].mxu1 }
 0x28b   : > { %2229 = vpow2.f32 %v1922_v24  ;;  %v2658_v27 = vadd.f32 %v2125_v26, %v2643_v13  ;;  %v1208_v28 = vpop.f32.mrb[5].mxu1 }
 0x28c   : > { %2231 = vpow2.f32 %v1921_v25  ;;  %v2661_v30 = vadd.f32 %v2643_v13, %v1208_v28 }
 0x28d   : > { %v1924_v31 = vmul.f32 -1.442695, %v2658_v27 }
 0x28e   : > { %v1923_v33 = vmul.f32 -1.442695, %v2661_v30  ;;  %v2128_v34 = vpop.f32.mrb[6].mxu1 }
 0x28f   : > { %2233 = vpow2.f32 %v1924_v31  ;;  %v2666_v36 = vadd.f32 %v2128_v34, %v2643_v13  ;;  %v1218_v37 = vpop.f32.mrb[7].mxu1 }
 0x290   : > { %2235 = vpow2.f32 %v1923_v33  ;;  %v2669_v39 = vadd.f32 %v2643_v13, %v1218_v37 }
 0x291   : > { %v2226_v40 = vpop.eup %2225  ;;  %v1926_v42 = vmul.f32 -1.442695, %v2666_v36 }
 0x292   : > { %v2228_v44 = vpop.eup %2227  ;;  %v1339_v45 = vadd.f32 1.0, %v2226_v40  ;;  %v1925_v46 = vmul.f32 -1.442695, %v2669_v39  ;;  %v2131_v48 = vpop.f32.mrb[8].mxu1 }
 0x293   : > { %v1338_v50 = vadd.f32 1.0, %v2228_v44  ;;  %2237 = vpow2.f32 %v1926_v42  ;;  %v2674_v51 = vadd.f32 %v2131_v48, %v2643_v13  ;;  %v1228_v52 = vpop.f32.mrb[9].mxu1 }
 0x294   : > { %2239 = vrcp.f32 %v1339_v45  ;;  %v2677_v54 = vadd.f32 %v2643_v13, %v1228_v52 }
 0x295   : > { %v2230_v56 = vpop.eup %2229  ;;  %2241 = vrcp.f32 %v1338_v50  ;;  %v1928_v57 = vmul.f32 -1.442695, %v2674_v51 }
 0x296   : > { %v2232_v58 = vpop.eup %2231  ;;  %v1341_v60 = vadd.f32 1.0, %v2230_v56  ;;  %2243 = vpow2.f32 %v1925_v46  ;;  %v1927_v62 = vmul.f32 -1.442695, %v2677_v54  ;;  %v2134_v63 = vpop.f32.mrb[10].mxu1 }
 0x297   : > { %v1340_v0 = vadd.f32 1.0, %v2232_v58  ;;  %2245 = vpow2.f32 %v1928_v57  ;;  %v2682_v2 = vadd.f32 %v2134_v63, %v2643_v13  ;;  %v1238_v4 = vpop.f32.mrb[11].mxu1 }
 0x298   : > { %2247 = vrcp.f32 %v1341_v60  ;;  %v2685_v5 = vadd.f32 %v2643_v13, %v1238_v4 }
 0x299   : > { %v2234_v6 = vpop.eup %2233  ;;  %2249 = vrcp.f32 %v1340_v0  ;;  %v1930_v8 = vmul.f32 -1.442695, %v2682_v2 }
 0x29a   : > { %v2236_v10 = vpop.eup %2235  ;;  %v1343_v11 = vadd.f32 1.0, %v2234_v6  ;;  %2251 = vpow2.f32 %v1927_v62  ;;  %v1929_v12 = vmul.f32 -1.442695, %v2685_v5  ;;  %v2137_v14 = vpop.f32.mrb[12].mxu1 }
 0x29b   : > { %v1342_v15 = vadd.f32 1.0, %v2236_v10  ;;  %2253 = vpow2.f32 %v1930_v8  ;;  %v2690_v16 = vadd.f32 %v2137_v14, %v2643_v13  ;;  %v1248_v17 = vpop.f32.mrb[13].mxu1 }
 0x29c   : > { %2255 = vrcp.f32 %v1343_v11  ;;  %v2693_v18 = vadd.f32 %v2643_v13, %v1248_v17 }
 0x29d   : > { %v2238_v19 = vpop.eup %2237  ;;  %2257 = vrcp.f32 %v1342_v15  ;;  %v1932_v20 = vmul.f32 -1.442695, %v2690_v16 }
 0x29e   : > { %v2696_v22 = vpop.eup %2239  ;;  %v1345_v24 = vadd.f32 1.0, %v2238_v19  ;;  %2259 = vpow2.f32 %v1929_v12  ;;  %v1931_v25 = vmul.f32 -1.442695, %v2693_v18  ;;  %v2140_v26 = vpop.f32.mrb[14].mxu1 }
 0x29f   : > { %v2699_v28 = vpop.eup %2241  ;;  %2261 = vpow2.f32 %v1932_v20  ;;  %v2702_v31 = vadd.f32 %v2140_v26, %v2643_v13  ;;  %1404 = vrot.lane.b32.xlu1 %v2696_v22, %s2299_s14  ;;  %v1258_v33 = vpop.f32.mrb[15].mxu1 }
 0x2a0   : > { %v2244_v34 = vpop.eup %2243  ;;  %2263 = vrcp.f32 %v1345_v24  ;;  %v2707_v37 = vadd.f32 %v2643_v13, %v1258_v33  ;;  %1402 = vrot.lane.b32.xlu0 %v2699_v28, %s2299_s14 }
 0x2a1   : > { %v2246_v40 = vpop.eup %2245  ;;  %v1344_v42 = vadd.f32 1.0, %v2244_v34  ;;  %2265 = vpow2.f32 %v1931_v25  ;;  %v1934_v44 = vmul.f32 -1.442695, %v2702_v31 }
 0x2a2   : > { %v2712_v45 = vpop.eup %2247  ;;  %v1347_v46 = vadd.f32 1.0, %v2246_v40  ;;  %v1933_v48 = vmul.f32 -1.442695, %v2707_v37 }
 0x2a3   : > { %v2715_v50 = vpop.eup %2249  ;;  %2267 = vrcp.f32 %v1344_v42  ;;  %1408 = vrot.lane.b32.xlu1 %v2712_v45, %s2299_s14 }
 0x2a4   : > { %v2252_v13 = vpop.eup %2251  ;;  %2269 = vrcp.f32 %v1347_v46  ;;  %1406 = vrot.lane.b32.xlu0 %v2715_v50, %s2299_s14 }
 0x2a5   : > { %v2254_v52 = vpop.eup %2253  ;;  %v1346_v56 = vadd.f32 1.0, %v2252_v13  ;;  %2271 = vpow2.f32 %v1934_v44 }
 0x2a6   : > { %v2721_v57 = vpop.eup %2255  ;;  %v1349_v58 = vadd.f32 1.0, %v2254_v52  ;;  %2273 = vpow2.f32 %v1933_v48 }
 0x2a7   : > { %v2723_v60 = vpop.eup %2257  ;;  %2275 = vrcp.f32 %v1346_v56  ;;  %1412 = vrot.lane.b32.xlu1 %v2721_v57, %s2299_s14 }
 0x2a8   : > { %v2260_v62 = vpop.eup %2259  ;;  %2277 = vrcp.f32 %v1349_v58  ;;  %1410 = vrot.lane.b32.xlu0 %v2723_v60, %s2299_s14 }
 0x2a9   : > { %v2262_v63 = vpop.eup %2261  ;;  %v1348_v0 = vadd.f32 1.0, %v2260_v62 }
 0x2aa   : > { %v2729_v4 = vpop.eup %2263  ;;  %v1351_v6 = vadd.f32 1.0, %v2262_v63 }
 0x2ab   : > { %v2266_v8 = vpop.eup %2265  ;;  %2279 = vrcp.f32 %v1348_v0  ;;  %1416 = vrot.lane.b32.xlu1 %v2729_v4, %s2299_s14 }
 0x2ac   : > { %2281 = vrcp.f32 %v1351_v6  ;;  %v1350_v10 = vadd.f32 1.0, %v2266_v8 }
 0x2ad   : > { %v2733_v11 = vpop.eup %2267 }
 0x2ae   : > { %v2735_v12 = vpop.eup %2269  ;;  %2283 = vrcp.f32 %v1350_v10  ;;  %1414 = vrot.lane.b32.xlu0 %v2733_v11, %s2299_s14 }
 0x2af   : > { %v2272_v14 = vpop.eup %2271  ;;  %1420 = vrot.lane.b32.xlu1 %v2735_v12, %s2299_s14 }
 0x2b0   : > { %v2274_v15 = vpop.eup %2273  ;;  %v1353_v17 = vadd.f32 1.0, %v2272_v14 }
 0x2b1   : > { %v2741_v19 = vpop.eup %2275  ;;  %v1352_v20 = vadd.f32 1.0, %v2274_v15 }
 0x2b2   : > { %v2743_v24 = vpop.eup %2277  ;;  %2285 = vrcp.f32 %v1353_v17  ;;  %1418 = vrot.lane.b32.xlu0 %v2741_v19, %s2299_s14 }
 0x2b3   : > { %2287 = vrcp.f32 %v1352_v20  ;;  %1424 = vrot.lane.b32.xlu1 %v2743_v24, %s2299_s14 }
 0x2b5   : > { %v2749_v25 = vpop.eup %2279 }
 0x2b6   : > { %v2751_v26 = vpop.eup %2281  ;;  %1422 = vrot.lane.b32.xlu0 %v2749_v25, %s2299_s14 }
 0x2b7   : > { %1428 = vrot.lane.b32.xlu1 %v2751_v26, %s2299_s14 }
 0x2b8   : > { %v2757_v33 = vpop.eup %2283 }
 0x2ba   : > { %1426 = vrot.lane.b32.xlu0 %v2757_v33, %s2299_s14 }
 0x2bc   : > { %v2761_v34 = vpop.eup %2285 }
 0x2bd   : > { %v2763_v40 = vpop.eup %2287  ;;  %1432 = vrot.lane.b32.xlu1 %v2761_v34, %s2299_s14 }
 0x2be   : > { %1430 = vrot.lane.b32.xlu0 %v2763_v40, %s2299_s14 }
 0x2c1   : > { %1488 = vrot.lane.b32.xlu1 %v2650_v21, %s2299_s14 }
 0x2c2   : > { %1486 = vrot.lane.b32.xlu0 %v2653_v23, %s2299_s14 }
 0x2c5   : > { %1492 = vrot.lane.b32.xlu1 %v2658_v27, %s2299_s14 }
 0x2c6   : > { %1490 = vrot.lane.b32.xlu0 %v2661_v30, %s2299_s14 }
 0x2c9   : > { %1496 = vrot.lane.b32.xlu1 %v2666_v36, %s2299_s14 }
 0x2ca   : > { %1494 = vrot.lane.b32.xlu0 %v2669_v39, %s2299_s14 }
 0x2cd   : > { %1500 = vrot.lane.b32.xlu1 %v2674_v51, %s2299_s14 }
 0x2ce   : > { %1498 = vrot.lane.b32.xlu0 %v2677_v54, %s2299_s14 }
 0x2d1   : > { %1504 = vrot.lane.b32.xlu1 %v2682_v2, %s2299_s14 }
 0x2d2   : > { %1502 = vrot.lane.b32.xlu0 %v2685_v5, %s2299_s14 }
 0x2d5   : > { %1508 = vrot.lane.b32.xlu1 %v2690_v16, %s2299_s14 }
 0x2d6   : > { %1506 = vrot.lane.b32.xlu0 %v2693_v18, %s2299_s14 }
 0x2d9   : > { %1512 = vrot.lane.b32.xlu1 %v2702_v31, %s2299_s14 }
 0x2da   : > { %1510 = vrot.lane.b32.xlu0 %v2707_v37, %s2299_s14 }
 0x2f7   : > { %v2797_v21 = vpop.permute.xlu1 %1484 }
 0x2f8   : > { %v2799_v23 = vpop.permute.xlu0 %1482 }
 0x311   : > { %v1405_v27 = vpop.permute.xlu1 %1404 }
 0x312   : > { %v1451_v30 = vmul.f32 %v1405_v27, %v2496_v32  ;;  %v1403_v36 = vpop.permute.xlu0 %1402 }
 0x313   : > { %v1450_v39 = vmul.f32 %v1403_v36, %v2490_v29 }
 0x314   : > { %v1955_v51 = vpack.c.bf16 %v1451_v30, %v1451_v30  ;;  %1548 = vrot.lane.b32.xlu1 %v1451_v30, %s2300_s19 }
 0x315   : > { %v1954_v54 = vpack.c.bf16 %v1450_v39, %v1450_v39  ;;  %v1409_v2 = vpop.permute.xlu1 %1408  ;;  %1546 = vrot.lane.b32.xlu0 %v1450_v39, %s2300_s19 }
 0x316   : > { %1709 = vst.msk [vmem:[%s2806_s18 + $0x4] sm:$0xf] %vm1707_vm4, %v1955_v51  ;;  %v1453_v32 = vmul.f32 %v1409_v2, %v2509_v38  ;;  %v1407_v5 = vpop.permute.xlu0 %1406 }
 0x317   : > { %1708 = vst.msk [vmem:[%s2806_s18] sm:$0xf] %vm1707_vm4, %v1954_v54  ;;  %v1452_v16 = vmul.f32 %v1407_v5, %v2502_v35 }
 0x318   : > { %v1957_v29 = vpack.c.bf16 %v1453_v32, %v1453_v32  ;;  %1552 = vrot.lane.b32.xlu1 %v1453_v32, %s2300_s19 }
 0x319   : > { %v1956_v18 = vpack.c.bf16 %v1452_v16, %v1452_v16  ;;  %v1413_v31 = vpop.permute.xlu1 %1412  ;;  %1550 = vrot.lane.b32.xlu0 %v1452_v16, %s2300_s19 }
 0x31a   : > { %1711 = vst.msk [vmem:[%s2806_s18 + $0xc] sm:$0xf] %vm1707_vm4, %v1957_v29  ;;  %v1455_v37 = vmul.f32 %v1413_v31, %v2518_v43  ;;  %v1411_v42 = vpop.permute.xlu0 %1410 }
 0x31b   : > { %1710 = vst.msk [vmem:[%s2806_s18 + $0x8] sm:$0xf] %vm1707_vm4, %v1956_v18  ;;  %v1454_v38 = vmul.f32 %v1411_v42, %v2515_v41 }
 0x31c   : > { %v1959_v35 = vpack.c.bf16 %v1455_v37, %v1455_v37  ;;  %1556 = vrot.lane.b32.xlu1 %v1455_v37, %s2300_s19 }
 0x31d   : > { %v1958_v44 = vpack.c.bf16 %v1454_v38, %v1454_v38  ;;  %v1417_v46 = vpop.permute.xlu1 %1416  ;;  %1554 = vrot.lane.b32.xlu0 %v1454_v38, %s2300_s19 }
 0x31e   : > { %1713 = vst.msk [vmem:[%s2806_s18 + $0x14] sm:$0xf] %vm1707_vm4, %v1959_v35  ;;  %v1457_v48 = vmul.f32 %v1417_v46, %v2530_v49  ;;  %v1595_v35 = vsel %vm853_vm0, %v2696_v22, %v2797_v21  ;;  %v1594_v46 = vsel %vm853_vm0, %v2699_v28, %v2799_v23 }
 0x31f   : > { %1712 = vst.msk [vmem:[%s2806_s18 + $0x10] sm:$0xf] %vm1707_vm4, %v1958_v44 }
 0x320   : > { %v1961_v43 = vpack.c.bf16 %v1457_v48, %v1457_v48  ;;  %v1415_v13 = vpop.permute.xlu0 %1414  ;;  %1560 = vrot.lane.b32.xlu1 %v1457_v48, %s2300_s19 }
 0x321   : > { %v1456_v41 = vmul.f32 %v1415_v13, %v2527_v47  ;;  %v1421_v52 = vpop.permute.xlu1 %1420 }
 0x322   : > { %1715 = vst.msk [vmem:[%s2806_s18 + $0x1c] sm:$0xf] %vm1707_vm4, %v1961_v43  ;;  %v1459_v56 = vmul.f32 %v1421_v52, %v2542_v55 }
 0x323   : > { %v1960_v58 = vpack.c.bf16 %v1456_v41, %v1456_v41  ;;  %1558 = vrot.lane.b32.xlu0 %v1456_v41, %s2300_s19 }
 0x324   : > { %v1963_v62 = vpack.c.bf16 %v1459_v56, %v1459_v56  ;;  %v1419_v49 = vpop.permute.xlu0 %1418  ;;  %1564 = vrot.lane.b32.xlu1 %v1459_v56, %s2300_s19 }
 0x325   : > { %1714 = vst.msk [vmem:[%s2806_s18 + $0x18] sm:$0xf] %vm1707_vm4, %v1960_v58  ;;  %v1458_v63 = vmul.f32 %v1419_v49, %v2539_v53  ;;  %v1425_v0 = vpop.permute.xlu1 %1424 }
 0x326   : > { %1717 = vst.msk [vmem:[%s2806_s18 + $0x24] sm:$0xf] %vm1707_vm4, %v1963_v62  ;;  %v1461_v47 = vmul.f32 %v1425_v0, %v2554_v61 }
 0x327   : > { %v1962_v55 = vpack.c.bf16 %v1458_v63, %v1458_v63  ;;  %1562 = vrot.lane.b32.xlu0 %v1458_v63, %s2300_s19 }
 0x328   : > { %v1965_v6 = vpack.c.bf16 %v1461_v47, %v1461_v47  ;;  %v1423_v8 = vpop.permute.xlu0 %1422  ;;  %1568 = vrot.lane.b32.xlu1 %v1461_v47, %s2300_s19 }
 0x329   : > { %1716 = vst.msk [vmem:[%s2806_s18 + $0x20] sm:$0xf] %vm1707_vm4, %v1962_v55  ;;  %v1460_v10 = vmul.f32 %v1423_v8, %v2551_v59  ;;  %v1429_v14 = vpop.permute.xlu1 %1428 }
 0x32a   : > { %1719 = vst.msk [vmem:[%s2806_s18 + $0x2c] sm:$0xf] %vm1707_vm4, %v1965_v6  ;;  %v1463_v53 = vmul.f32 %v1429_v14, %v2566_v3 }
 0x32b   : > { %v1964_v61 = vpack.c.bf16 %v1460_v10, %v1460_v10  ;;  %1566 = vrot.lane.b32.xlu0 %v1460_v10, %s2300_s19 }
 0x32c   : > { %v1967_v15 = vpack.c.bf16 %v1463_v53, %v1463_v53  ;;  %v1427_v17 = vpop.permute.xlu0 %1426  ;;  %1572 = vrot.lane.b32.xlu1 %v1463_v53, %s2300_s19 }
 0x32d   : > { %1718 = vst.msk [vmem:[%s2806_s18 + $0x28] sm:$0xf] %vm1707_vm4, %v1964_v61  ;;  %v1462_v20 = vmul.f32 %v1427_v17, %v2563_v1 }
 0x32e   : > { %1721 = vst.msk [vmem:[%s2806_s18 + $0x34] sm:$0xf] %vm1707_vm4, %v1967_v15 }
 0x32f   : > { %v1966_v59 = vpack.c.bf16 %v1462_v20, %v1462_v20  ;;  %v1433_v27 = vpop.permute.xlu1 %1432  ;;  %1570 = vrot.lane.b32.xlu0 %v1462_v20, %s2300_s19 }
 0x330   : > { %v1465_v3 = vmul.f32 %v1433_v27, %v2584_v9  ;;  %v1431_v30 = vpop.permute.xlu0 %1430 }
 0x331   : > { %1720 = vst.msk [vmem:[%s2806_s18 + $0x30] sm:$0xf] %vm1707_vm4, %v1966_v59  ;;  %v1464_v36 = vmul.f32 %v1431_v30, %v2575_v7 }
 0x332   : > { %v1969_v39 = vpack.c.bf16 %v1465_v3, %v1465_v3  ;;  %1576 = vrot.lane.b32.xlu1 %v1465_v3, %s2300_s19 }
 0x333   : > { %v1968_v51 = vpack.c.bf16 %v1464_v36, %v1464_v36  ;;  %1574 = vrot.lane.b32.xlu0 %v1464_v36, %s2300_s19  ;;  %v1489_v1 = vpop.permute.xlu1 %1488 }
 0x334   : > { %1723 = vst.msk [vmem:[%s2806_s18 + $0x3c] sm:$0xf] %vm1707_vm4, %v1969_v39  ;;  %v1487_v54 = vpop.permute.xlu0 %1486  ;;  %v1597_v41 = vsel %vm853_vm0, %v2712_v45, %v1489_v1 }
 0x335   : > { %1722 = vst.msk [vmem:[%s2806_s18 + $0x38] sm:$0xf] %vm1707_vm4, %v1968_v51  ;;  %v1596_v21 = vsel %vm853_vm0, %v2715_v50, %v1487_v54 }
 0x337   : > { %v1493_v2 = vpop.permute.xlu1 %1492 }
 0x338   : > { %v1491_v9 = vpop.permute.xlu0 %1490  ;;  %v1599_v56 = vsel %vm853_vm0, %v2721_v57, %v1493_v2 }
 0x339   : > { %v1598_v45 = vsel %vm853_vm0, %v2723_v60, %v1491_v9 }
 0x33b   : > { %v1497_v32 = vpop.permute.xlu1 %1496 }
 0x33c   : > { %v1495_v5 = vpop.permute.xlu0 %1494  ;;  %v1601_v63 = vsel %vm853_vm0, %v2729_v4, %v1497_v32 }
 0x33d   : > { %v1600_v60 = vsel %vm853_vm0, %v2733_v11, %v1495_v5 }
 0x33f   : > { %v1501_v16 = vpop.permute.xlu1 %1500 }
 0x340   : > { %v1499_v29 = vpop.permute.xlu0 %1498  ;;  %v1603_v55 = vsel %vm853_vm0, %v2735_v12, %v1501_v16 }
 0x341   : > { %v1602_v10 = vsel %vm853_vm0, %v2741_v19, %v1499_v29 }
 0x343   : > { %v1505_v7 = vpop.permute.xlu1 %1504 }
 0x344   : > { %v1503_v18 = vpop.permute.xlu0 %1502  ;;  %v1605_v11 = vsel %vm853_vm0, %v2743_v24, %v1505_v7 }
 0x345   : > { %v1604_v15 = vsel %vm853_vm0, %v2749_v25, %v1503_v18 }
 0x347   : > { %v1509_v31 = vpop.permute.xlu1 %1508 }
 0x348   : > { %v1507_v37 = vpop.permute.xlu0 %1506  ;;  %v1607_v19 = vsel %vm853_vm0, %v2751_v26, %v1509_v31 }
 0x349   : > { %v1606_v27 = vsel %vm853_vm0, %v2757_v33, %v1507_v37 }
 0x34b   : > { %v1513_v42 = vpop.permute.xlu1 %1512 }
 0x34c   : > { %v1511_v38 = vpop.permute.xlu0 %1510  ;;  %v1609_v26 = vsel %vm853_vm0, %v2761_v34, %v1513_v42 }
 0x34d   : > { %v1608_v36 = vsel %vm853_vm0, %v2763_v40, %v1511_v38 }
 0x386   : > { %v1549_v44 = vpop.permute.xlu1 %1548 }
 0x387   : > { %v1611_v48 = vsel %vm879_vm1, %v1595_v35, %v1549_v44  ;;  %v1547_v43 = vpop.permute.xlu0 %1546 }
 0x388   : > { %1628 = vst.msk [vmem:[%s2875_s21 + $0x8] sm:$0xff] %vm1626_vm5, %v1611_v48  ;;  %v1610_v13 = vsel %vm879_vm1, %v1594_v46, %v1547_v43 }
 0x389   : > { %1627 = vst.msk [vmem:[%s2875_s21] sm:$0xff] %vm1626_vm5, %v1610_v13 }
 0x38a   : > { %v1553_v22 = vpop.permute.xlu1 %1552 }
 0x38b   : > { %v1613_v28 = vsel %vm879_vm1, %v1597_v41, %v1553_v22  ;;  %v1551_v23 = vpop.permute.xlu0 %1550 }
 0x38c   : > { %1630 = vst.msk [vmem:[%s2875_s21 + $0x18] sm:$0xff] %vm1626_vm5, %v1613_v28  ;;  %v1612_v52 = vsel %vm879_vm1, %v1596_v21, %v1551_v23 }
 0x38d   : > { %1629 = vst.msk [vmem:[%s2875_s21 + $0x10] sm:$0xff] %vm1626_vm5, %v1612_v52 }
 0x38e   : > { %v1557_v58 = vpop.permute.xlu1 %1556 }
 0x38f   : > { %v1615_v50 = vsel %vm879_vm1, %v1599_v56, %v1557_v58  ;;  %v1555_v62 = vpop.permute.xlu0 %1554 }
 0x390   : > { %1632 = vst.msk [vmem:[%s2875_s21 + $0x28] sm:$0xff] %vm1626_vm5, %v1615_v50  ;;  %v1614_v49 = vsel %vm879_vm1, %v1598_v45, %v1555_v62 }
 0x391   : > { %1631 = vst.msk [vmem:[%s2875_s21 + $0x20] sm:$0xff] %vm1626_vm5, %v1614_v49 }
 0x392   : > { %v1561_v0 = vpop.permute.xlu1 %1560 }
 0x393   : > { %v1617_v57 = vsel %vm879_vm1, %v1601_v63, %v1561_v0 }
 0x394   : > { %1634 = vst.msk [vmem:[%s2875_s21 + $0x38] sm:$0xff] %vm1626_vm5, %v1617_v57 }
 0x395   : > { %v1559_v47 = vpop.permute.xlu0 %1558 }
 0x396   : > { %v1616_v6 = vsel %vm879_vm1, %v1600_v60, %v1559_v47  ;;  %v1565_v8 = vpop.permute.xlu1 %1564 }
 0x397   : > { %1633 = vst.msk [vmem:[%s2875_s21 + $0x30] sm:$0xff] %vm1626_vm5, %v1616_v6  ;;  %v1619_v4 = vsel %vm879_vm1, %v1603_v55, %v1565_v8 }
 0x398   : > { %1636 = vst.msk [vmem:[%s2875_s21 + $0x48] sm:$0xff] %vm1626_vm5, %v1619_v4 }
 0x399   : > { %v1563_v14 = vpop.permute.xlu0 %1562 }
 0x39a   : > { %v1618_v12 = vsel %vm879_vm1, %v1602_v10, %v1563_v14  ;;  %v1569_v53 = vpop.permute.xlu1 %1568 }
 0x39b   : > { %1635 = vst.msk [vmem:[%s2875_s21 + $0x40] sm:$0xff] %vm1626_vm5, %v1618_v12  ;;  %v1621_v61 = vsel %vm879_vm1, %v1605_v11, %v1569_v53 }
 0x39c   : > { %1638 = vst.msk [vmem:[%s2875_s21 + $0x58] sm:$0xff] %vm1626_vm5, %v1621_v61 }
 0x39d   : > { %v1567_v17 = vpop.permute.xlu0 %1566 }
 0x39e   : > { %v1620_v24 = vsel %vm879_vm1, %v1604_v15, %v1567_v17  ;;  %v1573_v20 = vpop.permute.xlu1 %1572 }
 0x39f   : > { %1637 = vst.msk [vmem:[%s2875_s21 + $0x50] sm:$0xff] %vm1626_vm5, %v1620_v24  ;;  %v1623_v59 = vsel %vm879_vm1, %v1607_v19, %v1573_v20 }
 0x3a0   : > { %1640 = vst.msk [vmem:[%s2875_s21 + $0x68] sm:$0xff] %vm1626_vm5, %v1623_v59 }
 0x3a1   : > { %v1571_v3 = vpop.permute.xlu0 %1570 }
 0x3a2   : > { %v1622_v25 = vsel %vm879_vm1, %v1606_v27, %v1571_v3 }
 0x3a3   : > { %1639 = vst.msk [vmem:[%s2875_s21 + $0x60] sm:$0xff] %vm1626_vm5, %v1622_v25 }
 0x3a4   : > { %v1577_v30 = vpop.permute.xlu1 %1576 }
 0x3a5   : > { %v1625_v39 = vsel %vm879_vm1, %v1609_v26, %v1577_v30  ;;  %v1575_v51 = vpop.permute.xlu0 %1574 }
 0x3a6   : > { %1642 = vst.msk [vmem:[%s2875_s21 + $0x78] sm:$0xff] %vm1626_vm5, %v1625_v39  ;;  %v1624_v1 = vsel %vm879_vm1, %v1608_v36, %v1575_v51 }
 0x3a7   : > { %1641 = vst.msk [vmem:[%s2875_s21 + $0x70] sm:$0xff] %vm1626_vm5, %v1624_v1 }
 0x3a8 PF: > { %s19_s27 = sadd.s32 1, %s2295_s27  }
 0x3a9   : > { %p16_p4 = scmp.ge.s32.totalorder %s19_s27, 4  }
 0x3ab   :  { %18 = sbr.rel (!%p16_p4) target bundleno = 1 (0x1), region = 96 }

</bundles_post_ra>
